<compile_context>
chip_gen: v7x
topology: tpu7x:2x2x1
jax: 0.10.0
libtpu: 0.0.40
codegen_flags: <defaults>
</compile_context>

<pallas_src>
import jax
import jax.numpy as jnp
from jax.experimental import pallas as pl
from jax.experimental.pallas import tpu as pltpu


def _round_up(x, m):
    return ((x + m - 1) // m) * m


def critic_kernel(s_ref, a_ref, w1s_ref, w1a_ref, b1_ref, w2_ref, b2_ref,
                  w3r_ref, b3_ref, o_ref):
    """One batch tile of the Critic MLP (runs entirely in VMEM)."""
    # Layer 1 as a split matmul: state @ W1[:S] + action @ W1[S:] + b1.
    h1 = (jnp.dot(s_ref[...], w1s_ref[...], preferred_element_type=jnp.float32)
          + jnp.dot(a_ref[...], w1a_ref[...], preferred_element_type=jnp.float32)
          + b1_ref[...])
    # Cast back to the weight dtype so the next dot stays on the fast MXU path
    # when bf16 operands are used (no-op cast for f32).
    h1 = jnp.maximum(h1, 0.0).astype(w2_ref.dtype)

    h2 = jnp.dot(h1, w2_ref[...], preferred_element_type=jnp.float32) + b2_ref[...]
    h2 = jnp.maximum(h2, 0.0)

    # Scalar head: VPU multiply + XLU lane reduce instead of an N=1 MXU matmul.
    out = jnp.sum(h2 * w3r_ref[...], axis=-1, keepdims=True) + b3_ref[...]
    # NOTE: (TB, 1) output is lane-sparse (masked stores), but the writeback is
    # only 4 bytes per batch row — negligible vs. the two matmuls per tile.
    o_ref[...] = out.astype(o_ref.dtype)


def critic_forward(state, action, params, *, block_b=512, compute_dtype=None):
    """Critic forward pass as a batch-tiled Pallas kernel.

    Args:
      state:  (B, state_dim)  float32
      action: (B, action_dim) float32
      params: (w1, b1, w2, b2, w3, b3) with weights as (in, out)
      block_b: batch tile size (rounded to a multiple of 16)
      compute_dtype: optional dtype (e.g. jnp.bfloat16) for matmul operands;
        accumulation and the scalar head stay in float32.
    Returns:
      (B, 1) float32 Q-values, identical semantics to the PyTorch module.
    """
    w1, b1, w2, b2, w3, b3 = params
    B, S = state.shape
    A = action.shape[1]
    H = w1.shape[1]

    # One-time wrapper-side reshapes: split W1, head row, f32 biases.
    w1s, w1a = w1[:S], w1[S:]
    w3r = w3.reshape(1, H).astype(jnp.float32)
    b1r = b1.reshape(1, H).astype(jnp.float32)
    b2r = b2.reshape(1, H).astype(jnp.float32)
    b3r = b3.reshape(1, 1).astype(jnp.float32)

    if compute_dtype is not None:
        state = state.astype(compute_dtype)
        action = action.astype(compute_dtype)
        w1s = w1s.astype(compute_dtype)
        w1a = w1a.astype(compute_dtype)
        w2 = w2.astype(compute_dtype)

    # Batch tile: multiple of 16 (safe for bf16 sublane packing), capped by B.
    TB = min(block_b, _round_up(B, 16))
    TB = _round_up(TB, 16)
    Bp = _round_up(B, TB)
    if Bp != B:
        pad = Bp - B
        state = jnp.pad(state, ((0, pad), (0, 0)))
        action = jnp.pad(action, ((0, pad), (0, 0)))

    grid = (Bp // TB,)

    batch_spec = lambda feat: pl.BlockSpec((TB, feat), lambda i: (i, 0))
    const_spec = lambda arr: pl.BlockSpec(arr.shape, lambda i: (0, 0))

    flops = 2 * B * ((S + A) * H + H * H + H)
    bytes_accessed = int(state.nbytes + action.nbytes + w1s.nbytes + w1a.nbytes
                         + b1r.nbytes + w2.nbytes + b2r.nbytes + w3r.nbytes
                         + b3r.nbytes + Bp * 4)

    out = pl.pallas_call(
        critic_kernel,
        out_shape=jax.ShapeDtypeStruct((Bp, 1), jnp.float32),
        grid=grid,
        in_specs=[
            batch_spec(S),                 # state tile
            batch_spec(A),                 # action tile
            const_spec(w1s), const_spec(w1a), const_spec(b1r),   # resident
            const_spec(w2), const_spec(b2r),
            const_spec(w3r), const_spec(b3r),
        ],
        out_specs=pl.BlockSpec((TB, 1), lambda i: (i, 0)),
        compiler_params=pltpu.CompilerParams(
            dimension_semantics=("parallel",)),   # shard batch tiles on v7x TCs
        cost_estimate=pl.CostEstimate(
            flops=flops, transcendentals=0, bytes_accessed=bytes_accessed),
    )(state, action, w1s, w1a, b1r, w2, b2r, w3r, b3r)

    return out[:B]


def init_critic_params(key, state_dim, action_dim, hidden_dim):
    """Deterministic init mirroring nn.Linear's default U(-1/sqrt(fan_in), ...).

    Weights stored as (in_features, out_features); biases as (1, out).
    """
    def linear(key, fan_in, fan_out):
        kw, kb = jax.random.split(key)
        bound = 1.0 / jnp.sqrt(float(fan_in))
        w = jax.random.uniform(kw, (fan_in, fan_out), jnp.float32, -bound, bound)
        b = jax.random.uniform(kb, (1, fan_out), jnp.float32, -bound, bound)
        return w, b

    k1, k2, k3 = jax.random.split(key, 3)
    w1, b1 = linear(k1, state_dim + action_dim, hidden_dim)
    w2, b2 = linear(k2, hidden_dim, hidden_dim)
    w3, b3 = linear(k3, hidden_dim, 1)
    return (w1, b1, w2, b2, w3, b3)


def critic_reference(state, action, params):
    """Plain-JAX reference for correctness checking."""
    w1, b1, w2, b2, w3, b3 = params
    x = jnp.concatenate([state, action], axis=1)
    x = jnp.maximum(x @ w1 + b1, 0.0)
    x = jnp.maximum(x @ w2 + b2, 0.0)
    return x @ w3 + b3


if __name__ == "__main__":
    # Small shapes consistent with the module.
    B, STATE_DIM, ACTION_DIM, HIDDEN_DIM = 8, 16, 8, 32

    key = jax.random.PRNGKey(0)
    k_state, k_action, k_params = jax.random.split(key, 3)

    state = jax.random.normal(k_state, (B, STATE_DIM), jnp.float32)
    action = jax.random.normal(k_action, (B, ACTION_DIM), jnp.float32)
    params = init_critic_params(k_params, STATE_DIM, ACTION_DIM, HIDDEN_DIM)

    # f32 path, tight tolerance.
    out = jax.block_until_ready(critic_forward(state, action, params))
    ref = critic_reference(state, action, params)
    assert out.shape == (B, 1), out.shape
    assert jnp.allclose(out, ref, atol=1e-5, rtol=1e-5), "mismatch vs reference (f32)"

    # Non-divisible batch: exercises multi-tile grid + batch padding.
    B2 = 50
    s2 = jax.random.normal(jax.random.PRNGKey(1), (B2, STATE_DIM), jnp.float32)
    a2 = jax.random.normal(jax.random.PRNGKey(2), (B2, ACTION_DIM), jnp.float32)
    out2 = jax.block_until_ready(critic_forward(s2, a2, params, block_b=32))
    ref2 = critic_reference(s2, a2, params)
    assert out2.shape == (B2, 1), out2.shape
    assert jnp.allclose(out2, ref2, atol=1e-5, rtol=1e-5), "mismatch vs reference (grid)"

    # bf16 matmul operands with f32 accumulation — looser tolerance.
    out3 = jax.block_until_ready(
        critic_forward(s2, a2, params, block_b=32, compute_dtype=jnp.bfloat16))
    assert out3.shape == (B2, 1), out3.shape
    assert jnp.allclose(out3, ref2, atol=5e-2, rtol=5e-2), "mismatch vs reference (bf16)"

    print("KERNEL_OK")
</pallas_src>

<mosaic_0001>
module attributes {stable_mosaic.version = 11 : i64} {
  func.func @critic_kernel(%arg0: i32, %arg1: memref<16x16xf32, #tpu.memory_space<vmem>>, %arg2: memref<16x8xf32, #tpu.memory_space<vmem>>, %arg3: memref<16x32xf32, #tpu.memory_space<vmem>>, %arg4: memref<8x32xf32, #tpu.memory_space<vmem>>, %arg5: memref<1x32xf32, #tpu.memory_space<vmem>>, %arg6: memref<32x32xf32, #tpu.memory_space<vmem>>, %arg7: memref<1x32xf32, #tpu.memory_space<vmem>>, %arg8: memref<1x32xf32, #tpu.memory_space<vmem>>, %arg9: memref<1x1xf32, #tpu.memory_space<vmem>>, %arg10: memref<16x1xf32, #tpu.memory_space<vmem>>) attributes {dimension_semantics = [#tpu.dimension_semantics<parallel>], iteration_bounds = array<i64: 1>, scalar_prefetch = 0 : i64, scratch_operands = 0 : i64, tpu.core_type = #tpu.core_type<tc>, window_params = [{transform_indices = @transform_0, window_bounds = array<i64: 16, 16>}, {transform_indices = @transform_1, window_bounds = array<i64: 16, 8>}, {pipeline_mode = #tpu.pipeline_mode<synchronous>, transform_indices = @transform_2, window_bounds = array<i64: 16, 32>}, {pipeline_mode = #tpu.pipeline_mode<synchronous>, transform_indices = @transform_3, window_bounds = array<i64: 8, 32>}, {pipeline_mode = #tpu.pipeline_mode<synchronous>, transform_indices = @transform_4, window_bounds = array<i64: 1, 32>}, {pipeline_mode = #tpu.pipeline_mode<synchronous>, transform_indices = @transform_5, window_bounds = array<i64: 32, 32>}, {pipeline_mode = #tpu.pipeline_mode<synchronous>, transform_indices = @transform_6, window_bounds = array<i64: 1, 32>}, {pipeline_mode = #tpu.pipeline_mode<synchronous>, transform_indices = @transform_7, window_bounds = array<i64: 1, 32>}, {pipeline_mode = #tpu.pipeline_mode<synchronous>, transform_indices = @transform_8, window_bounds = array<i64: 1, 1>}, {transform_indices = @transform_9, window_bounds = array<i64: 16, 1>}]} {
    %c0 = arith.constant 0 : index
    %c0_0 = arith.constant 0 : index
    %0 = vector.load %arg1[%c0, %c0_0] : memref<16x16xf32, #tpu.memory_space<vmem>>, vector<16x16xf32>
    %c0_1 = arith.constant 0 : index
    %c0_2 = arith.constant 0 : index
    %1 = vector.load %arg3[%c0_1, %c0_2] : memref<16x32xf32, #tpu.memory_space<vmem>>, vector<16x32xf32>
    %cst = arith.constant dense<0.000000e+00> : vector<16x32xf32>
    %2 = tpu.matmul %0, %1, %cst {dimension_numbers = #tpu.dot_dimension_numbers<[1], [0], [0], [1], [0, 0, 1, 1], [], []>} : vector<16x16xf32>, vector<16x32xf32>, vector<16x32xf32> -> vector<16x32xf32>
    %c0_3 = arith.constant 0 : index
    %c0_4 = arith.constant 0 : index
    %3 = vector.load %arg2[%c0_3, %c0_4] : memref<16x8xf32, #tpu.memory_space<vmem>>, vector<16x8xf32>
    %c0_5 = arith.constant 0 : index
    %c0_6 = arith.constant 0 : index
    %4 = vector.load %arg4[%c0_5, %c0_6] : memref<8x32xf32, #tpu.memory_space<vmem>>, vector<8x32xf32>
    %cst_7 = arith.constant dense<0.000000e+00> : vector<16x32xf32>
    %5 = tpu.matmul %3, %4, %cst_7 {dimension_numbers = #tpu.dot_dimension_numbers<[1], [0], [0], [1], [0, 0, 1, 1], [], []>} : vector<16x8xf32>, vector<8x32xf32>, vector<16x32xf32> -> vector<16x32xf32>
    %6 = arith.addf %2, %5 : vector<16x32xf32>
    %c0_8 = arith.constant 0 : index
    %c0_9 = arith.constant 0 : index
    %7 = vector.load %arg5[%c0_8, %c0_9] : memref<1x32xf32, #tpu.memory_space<vmem>>, vector<1x32xf32>
    %8 = vector.broadcast %7 : vector<1x32xf32> to vector<16x32xf32>
    %9 = arith.addf %6, %8 : vector<16x32xf32>
    %cst_10 = arith.constant 0.000000e+00 : f32
    %10 = vector.broadcast %cst_10 : f32 to vector<16x32xf32>
    %11 = arith.maximumf %9, %10 : vector<16x32xf32>
    %c0_11 = arith.constant 0 : index
    %c0_12 = arith.constant 0 : index
    %12 = vector.load %arg6[%c0_11, %c0_12] : memref<32x32xf32, #tpu.memory_space<vmem>>, vector<32x32xf32>
    %cst_13 = arith.constant dense<0.000000e+00> : vector<16x32xf32>
    %13 = tpu.matmul %11, %12, %cst_13 {dimension_numbers = #tpu.dot_dimension_numbers<[1], [0], [0], [1], [0, 0, 1, 1], [], []>} : vector<16x32xf32>, vector<32x32xf32>, vector<16x32xf32> -> vector<16x32xf32>
    %c0_14 = arith.constant 0 : index
    %c0_15 = arith.constant 0 : index
    %14 = vector.load %arg7[%c0_14, %c0_15] : memref<1x32xf32, #tpu.memory_space<vmem>>, vector<1x32xf32>
    %15 = vector.broadcast %14 : vector<1x32xf32> to vector<16x32xf32>
    %16 = arith.addf %13, %15 : vector<16x32xf32>
    %cst_16 = arith.constant 0.000000e+00 : f32
    %17 = vector.broadcast %cst_16 : f32 to vector<16x32xf32>
    %18 = arith.maximumf %16, %17 : vector<16x32xf32>
    %c0_17 = arith.constant 0 : index
    %c0_18 = arith.constant 0 : index
    %19 = vector.load %arg8[%c0_17, %c0_18] : memref<1x32xf32, #tpu.memory_space<vmem>>, vector<1x32xf32>
    %20 = vector.broadcast %19 : vector<1x32xf32> to vector<16x32xf32>
    %21 = arith.mulf %18, %20 : vector<16x32xf32>
    %cst_19 = arith.constant dense<0.000000e+00> : vector<16xf32>
    %22 = vector.multi_reduction <add>, %21, %cst_19 [1] : vector<16x32xf32> to vector<16xf32>
    %23 = vector.shape_cast %22 : vector<16xf32> to vector<16x1xf32>
    %c0_20 = arith.constant 0 : index
    %c0_21 = arith.constant 0 : index
    %24 = vector.load %arg9[%c0_20, %c0_21] : memref<1x1xf32, #tpu.memory_space<vmem>>, vector<1x1xf32>
    %25 = vector.broadcast %24 : vector<1x1xf32> to vector<16x1xf32>
    %26 = arith.addf %23, %25 : vector<16x1xf32>
    %c0_22 = arith.constant 0 : index
    %c0_23 = arith.constant 0 : index
    %27 = vector.load %arg10[%c0_22, %c0_23] : memref<16x1xf32, #tpu.memory_space<vmem>>, vector<16x1xf32>
    tpu.vector_store %arg10[%c0_22, %c0_23], %26 {strides = array<i32>} : memref<16x1xf32, #tpu.memory_space<vmem>>, vector<16x1xf32>,
    return
  }
  func.func @transform_0(%arg0: i32) -> (i32, i32) {
    %c0_i32 = arith.constant 0 : i32
    %c0_i32_0 = arith.constant 0 : i32
    return %arg0, %c0_i32 : i32, i32
  }
  func.func @transform_1(%arg0: i32) -> (i32, i32) {
    %c0_i32 = arith.constant 0 : i32
    %c0_i32_0 = arith.constant 0 : i32
    return %arg0, %c0_i32 : i32, i32
  }
  func.func @transform_2(%arg0: i32) -> (i32, i32) {
    %c0_i32 = arith.constant 0 : i32
    %c0_i32_0 = arith.constant 0 : i32
    %c0_i32_1 = arith.constant 0 : i32
    return %c0_i32, %c0_i32_0 : i32, i32
  }
  func.func @transform_3(%arg0: i32) -> (i32, i32) {
    %c0_i32 = arith.constant 0 : i32
    %c0_i32_0 = arith.constant 0 : i32
    %c0_i32_1 = arith.constant 0 : i32
    return %c0_i32, %c0_i32_0 : i32, i32
  }
  func.func @transform_4(%arg0: i32) -> (i32, i32) {
    %c0_i32 = arith.constant 0 : i32
    %c0_i32_0 = arith.constant 0 : i32
    %c0_i32_1 = arith.constant 0 : i32
    return %c0_i32, %c0_i32_0 : i32, i32
  }
  func.func @transform_5(%arg0: i32) -> (i32, i32) {
    %c0_i32 = arith.constant 0 : i32
    %c0_i32_0 = arith.constant 0 : i32
    %c0_i32_1 = arith.constant 0 : i32
    return %c0_i32, %c0_i32_0 : i32, i32
  }
  func.func @transform_6(%arg0: i32) -> (i32, i32) {
    %c0_i32 = arith.constant 0 : i32
    %c0_i32_0 = arith.constant 0 : i32
    %c0_i32_1 = arith.constant 0 : i32
    return %c0_i32, %c0_i32_0 : i32, i32
  }
  func.func @transform_7(%arg0: i32) -> (i32, i32) {
    %c0_i32 = arith.constant 0 : i32
    %c0_i32_0 = arith.constant 0 : i32
    %c0_i32_1 = arith.constant 0 : i32
    return %c0_i32, %c0_i32_0 : i32, i32
  }
  func.func @transform_8(%arg0: i32) -> (i32, i32) {
    %c0_i32 = arith.constant 0 : i32
    %c0_i32_0 = arith.constant 0 : i32
    %c0_i32_1 = arith.constant 0 : i32
    return %c0_i32, %c0_i32_0 : i32, i32
  }
  func.func @transform_9(%arg0: i32) -> (i32, i32) {
    %c0_i32 = arith.constant 0 : i32
    %c0_i32_0 = arith.constant 0 : i32
    return %arg0, %c0_i32 : i32, i32
  }
}

</mosaic_0001>

<bundles_post_ra>
// kernel: tpu_custom_call.1
= control target key start
LH: loop header
LB: loop body
LE: loop exit
PB: predicated region body
PF: predicated region fallthrough
CT: control target
= control target key end

     0   :  { %s605_s0 = inlined_call_operand.hbm [shape: f32[16,16], index: 0, kind: input, shape index: {}]   ;;  %s606_s1 = inlined_call_operand.vmem [shape: f32[16,8], index: 1, kind: input, shape index: {}]   ;;  %s607_s2 = inlined_call_operand.hbm [shape: f32[16,32], index: 2, kind: input, shape index: {}]   ;;  %s608_s3 = inlined_call_operand.vmem [shape: f32[8,32], index: 3, kind: input, shape index: {}]   ;;  %s609_s4 = inlined_call_operand.vmem [shape: f32[1,32], index: 4, kind: input, shape index: {}]   ;;  %s610_s5 = inlined_call_operand.vmem [shape: f32[32,32], index: 5, kind: input, shape index: {}]   ;;  %s611_s6 = inlined_call_operand.vmem [shape: f32[1,32], index: 6, kind: input, shape index: {}]   ;;  %s612_s7 = inlined_call_operand.vmem [shape: f32[1,32], index: 7, kind: input, shape index: {}]   ;;  %s613_s8 = inlined_call_operand.<no memory space> [shape: f32[1,1], index: 8, kind: input, shape index: {}]   ;;  %s614_s9 = inlined_call_operand.vmem [shape: f32[16,1], index: 9, kind: output, shape index: {}]  }
   0x1   :  { %v14_v0 = vstv %s613_s8 }
   0x2   :  { %15 = vst [vmem:[#allocation2] sm:$0x1] %v14_v0 }
   0x3   :  { %16 = vsyncpa [#allocation4], 0 }
   0x4   :  { %17 = vsyncpa [#allocation6], 0  ;;  %s484_s11 = smov [#allocation3]   ;;  %s436_s15 = scalar_lea.hbm %s605_s0, 256 }
   0x5   :  { %s23_s12 = sshll.u32 %s484_s11, 4  ;;  %p437_p0 = scmp.ne.s32.totalorder %s605_s0, %s436_s15  ;;  %s24_s12 = int_to_ptr.vmem [resolvable:$true] %s23_s12 }
   0x6   :  { %p440_p1 = scmp.lt.u32.totalorder %s436_s15, %s605_s0 }
   0x8   :  { %p442_p2 = pnand %p440_p1, %p437_p0 }
   0xa   :  { %445 = shalt.err (!%p442_p2)
}
   0xb   :  { %s446_s8 = scalar_lea.vmem %s24_s12, 256  ;;  %p451_p4 = scmp.lt.s32.totalorder %s24_s12, %s24_s12 }
   0xc   :  { %p447_p3 = scmp.ne.s32.totalorder %s24_s12, %s446_s8  ;;  %p452_p5 = scmp.lt.s32.totalorder %s446_s8, %s446_s8 }
   0xe   :  { %p453_p6 = por %p452_p5, %p451_p4 }
  0x10   :  { %p454_p7 = pnand %p453_p6, %p447_p3 }
  0x12   :  { %457 = shalt.err (!%p454_p7)
}
  0x13   :  { %s485_s20 = smov 128   ;;  %s486_s21 = smov 8  }
  0x14   :  { %29 = dma.hbm_to_vmem [thread:$0]  %s605_s0, 256, %s24_s12, [#allocation4], %s485_s20, %s485_s20, %s486_s21  }
  0x15   :  { %s487_s24 = smov [#allocation5]   ;;  %s458_s28 = scalar_lea.hbm %s607_s2, 256 }
  0x16   :  { %s37_s25 = sshll.u32 %s487_s24, 4  ;;  %p459_p8 = scmp.ne.s32.totalorder %s607_s2, %s458_s28  ;;  %s38_s25 = int_to_ptr.vmem [resolvable:$true] %s37_s25 }
  0x17   :  { %p462_p9 = scmp.lt.u32.totalorder %s458_s28, %s607_s2 }
  0x19   :  { %p464_p10 = pnand %p462_p9, %p459_p8 }
  0x1b   :  { %467 = shalt.err (!%p464_p10)
}
  0x1c   :  { %s468_s13 = scalar_lea.vmem %s38_s25, 256  ;;  %p473_p12 = scmp.lt.s32.totalorder %s38_s25, %s38_s25 }
  0x1d   :  { %p469_p11 = scmp.ne.s32.totalorder %s38_s25, %s468_s13  ;;  %p474_p13 = scmp.lt.s32.totalorder %s468_s13, %s468_s13 }
  0x1f   :  { %p475_p0 = por %p474_p13, %p473_p12 }
  0x21   :  { %p476_p1 = pnand %p475_p0, %p469_p11 }
  0x23   :  { %479 = shalt.err (!%p476_p1)
}
  0x24   :  { %43 = dma.hbm_to_vmem [thread:$0]  %s607_s2, 256, %s38_s25, [#allocation6], %s485_s20, %s485_s20, %s486_s21  }
  0x25   :  { %480 = dma.done.wait [#allocation4], 256  }
  0x26   :  { %481 = vsyncadd [#allocation4], 4294967040 }
  0x27   :  { %482 = dma.done.wait [#allocation6], 256  }
  0x28   :  { %483 = vsyncadd [#allocation6], 4294967040  ;;  %vm69_vm0 = vcmask 64512   ;;  %v68_v1 = vld [vmem:[%s608_s3] sm:$0xff]  ;;  %v67_v3 = vld [vmem:[%s606_s1 + $0x8] sm:$0xff]  ;;  %vm151_vm1 = vcmask 130048  }
  0x29   :  { %v66_v2 = vld [vmem:[%s606_s1] sm:$0xff]  ;;  %395 = vmatprep.subr.mxu0 %v68_v1  ;;  %v64_v4 = vld [vmem:[#allocation5] sm:$0xff]  ;;  %v245_v9 = vld [vmem:[%s610_s5 + $0x8] sm:$0xff]  ;;  %vm255_vm2 = vcmask 261120   ;;  %vm363_vm3 = vcmask 7168  }
  0x2a   :  { %397 = vmatprep.mubr.msk.f32.mxu0 %vm69_vm0, %v66_v2  ;;  %v65_v5 = vld [vmem:[#allocation5 + $0x8] sm:$0xff]  ;;  %v62_v6 = vld [vmem:[#allocation3] sm:$0xff]  ;;  %396 = vmatpush3.msra.mxu0 %v68_v1  ;;  %v63_v11 = vld [vmem:[#allocation3 + $0x8] sm:$0xff] }
  0x2b   :  { %v418_v7 = vpack.c.bf16 %v65_v5, %v64_v4  ;;  %v244_v8 = vld [vmem:[%s610_s5] sm:$0xff]  ;;  %398 = vmatmul.mubr.msk.f32.vlgmr.msra.gmra.mrb[0].mxu0 %vm69_vm0, %v67_v3  ;;  %v246_v12 = vld [vmem:[%s610_s5 + $0x10] sm:$0xff]  ;;  %v247_v13 = vld [vmem:[%s610_s5 + $0x18] sm:$0xff] }
  0x2c   :  { %v422_v10 = vpack.c.bf16 %v245_v9, %v244_v8  ;;  %404 = vmatprep.mubr.msk.f32.mxu0 %vm151_vm1, %v62_v6  ;;  %v426_v14 = vpack.c.bf16 %v247_v13, %v246_v12  ;;  %v376_v15 = vld [vmem:[%s609_s4] ss:$0 sm:$0xff] }
  0x2d   :  { %419 = vmatprep.subr.bf16.mxu0 %v418_v7  ;;  %v377_v22 = vld [vmem:[%s611_s6] ss:$0 sm:$0xff] }
  0x2e   :  { %421 = vmatpush3.bf16.msra.mxu0 %v418_v7  ;;  %423 = vmatprep.subr.bf16.mxu1 %v422_v10  ;;  %v380_v27 = vld [vmem:[%s612_s7] ss:$0 sm:$0xff] }
  0x2f   :  { %425 = vmatpush3.bf16.msra.mxu1 %v422_v10  ;;  %v381_v34 = vld [vmem:[#allocation2] ss:$0 sm:$0xff] }
  0x30   :  { %427 = vmatprep.subr.bf16.mxu1 %v426_v14 }
  0x33   :  { %405 = vmatmul.mubr.msk.f32.vlgmr.msra.gmra.mrb[0].mxu0 %vm151_vm1, %v63_v11  ;;  %429 = vmatpush3.bf16.msra.mxu1 %v426_v14 }
 0x106   :  { %v406_v16 = vpop.f32.mrb[0].mxu0 }
 0x107   :  { %v241_v17 = vadd.f32 %v406_v16, %v376_v15  ;;  %v224_v18 = vpop.f32.mrb[1].mxu0 }
 0x108   :  { %v240_v19 = vadd.f32 %v376_v15, %v224_v18 }
 0x109   :  { %v243_v21 = vmax.f32 %v241_v17, 0.0 }
 0x10a   :  { %v242_v20 = vmax.f32 %v240_v19, 0.0 }
 0x10c   :  { %415 = vmatprep.mubr.msk.f32.mxu1 %vm255_vm2, %v242_v20 }
 0x10d   :  { %416 = vmatmul.mubr.msk.f32.vlgmr.msra.gmra.mrb[0].mxu1 %vm255_vm2, %v243_v21 }
 0x1e0   :  { %v417_v23 = vpop.f32.mrb[0].mxu1 }
 0x1e1   :  { %v334_v24 = vadd.f32 %v417_v23, %v377_v22  ;;  %v328_v25 = vpop.f32.mrb[1].mxu1 }
 0x1e2   :  { %v329_v26 = vadd.f32 %v377_v22, %v328_v25 }
 0x1e3   :  { %v338_v28 = vmax.f32 %v334_v24, 0.0 }
 0x1e4   :  { %v337_v29 = vmax.f32 %v329_v26, 0.0 }
 0x1e5   :  { %v347_v32 = vmul.f32 %v380_v27, %v338_v28 }
 0x1e6   :  { %v346_v30 = vmul.f32 %v380_v27, %v337_v29 }
 0x1e7   :  { %v351_v33 = vsel %vm255_vm2, %v347_v32, 0.0 }
 0x1e8   :  { %v348_v31 = vsel %vm255_vm2, %v346_v30, 0.0 }
 0x1e9   :  { %349 = vadd.xlane.f32.xlu0 %v348_v31 }
 0x1ed   :  { %352 = vadd.xlane.f32.xlu0 %v351_v33 }
 0x276   :  { %v350_v35 = vpop.xlane.xlu0 %349 }
 0x277   :  { %v361_v36 = vadd.f32 %v381_v34, %v350_v35 }
 0x279   :  { %364 = vst.msk [vmem:[%s614_s9] sm:$0xff] %vm363_vm3, %v361_v36 }
 0x27a   :  { %v353_v37 = vpop.xlane.xlu0 %352 }
 0x27b   :  { %v362_v38 = vadd.f32 %v381_v34, %v353_v37 }
 0x27d   :  { %365 = vst.msk [vmem:[%s614_s9 + $0x8] sm:$0xff] %vm363_vm3, %v362_v38 }
 0x27e   :  { %370 = vsyncpa [#allocation4], 1 }
 0x27f   :  { %371 = vsyncpa [#allocation6], 1 }

</bundles_post_ra>
